<compile_context>
chip_gen: v7x
topology: tpu7x:2x2x1
jax: 0.10.0
libtpu: 0.0.40
codegen_flags: <defaults>
</compile_context>

<pallas_src>
import functools

import jax
import jax.numpy as jnp
from jax.experimental import pallas as pl
from jax.experimental.pallas import tpu as pltpu


_LANES = 512            # lane-dense last dim (multiple of 128)
_MAX_BLOCK_ROWS = 1024  # 1024 x 512 x 4B = 2 MiB f32 per block


def _fmix32(v):
    """lowbias32 integer finalizer (good avalanche on sequential counters)."""
    v = v ^ (v >> 16)
    v = v * jnp.uint32(0x7FEB352D)
    v = v ^ (v >> 15)
    v = v * jnp.uint32(0x846CA68B)
    v = v ^ (v >> 16)
    return v


def _gaussian_noise_kernel(seed_ref, x_ref, o_ref, *, std):
    rows, lanes = x_ref.shape
    half = lanes // 2

    # Per-block, per-element counters -> every tile draws distinct noise.
    blk = pl.program_id(0).astype(jnp.uint32)
    seed = seed_ref[0].astype(jnp.uint32)

    row = jax.lax.broadcasted_iota(jnp.int32, (rows, half), 0).astype(jnp.uint32)
    lane = jax.lax.broadcasted_iota(jnp.int32, (rows, half), 1).astype(jnp.uint32)
    g_row = blk * jnp.uint32(rows) + row
    n_left = g_row * jnp.uint32(lanes) + lane      # element ids of the left half
    n_right = n_left + jnp.uint32(half)            # element ids of the right half

    key = seed * jnp.uint32(0x9E3779B9) + jnp.uint32(0x85EBCA6B)
    b1 = _fmix32(n_left ^ key)
    b2 = _fmix32(n_right ^ key)

    # 23 random mantissa bits -> uniform float in [1, 2).
    mant = jnp.uint32(0x007FFFFF)
    one = jnp.uint32(0x3F800000)
    f1 = jax.lax.bitcast_convert_type((b1 & mant) | one, jnp.float32)
    f2 = jax.lax.bitcast_convert_type((b2 & mant) | one, jnp.float32)
    u1 = 2.0 - f1                         # (0, 1]  -> safe for log
    theta = (2.0 * jnp.pi) * (f2 - 1.0)   # [0, 2*pi)

    # Full Box-Muller pair; fold std into the half-width radius.
    r = jnp.sqrt(-2.0 * jnp.log(u1)) * std
    noise = jnp.concatenate([r * jnp.cos(theta), r * jnp.sin(theta)], axis=-1)

    o_ref[...] = (x_ref[...].astype(jnp.float32) + noise).astype(o_ref.dtype)


def gaussian_noise(x, *, std=0.05, seed=0):
    """Returns x + fresh N(0, std) noise of the same shape (Pallas kernel).

    Pass a different `seed` on every call to mirror PyTorch's fresh draw per
    forward (e.g. fold in a step counter).
    """
    orig_shape = x.shape
    total = x.size

    flat = x.reshape(-1)
    rows = pl.cdiv(total, _LANES)
    block_rows = rows if rows <= _MAX_BLOCK_ROWS else _MAX_BLOCK_ROWS
    padded_rows = pl.cdiv(rows, block_rows) * block_rows
    padded_total = padded_rows * _LANES
    if padded_total != total:
        flat = jnp.pad(flat, (0, padded_total - total))
    x2 = flat.reshape(padded_rows, _LANES)

    seed_arr = jnp.asarray([seed], dtype=jnp.int32)
    num_blocks = padded_rows // block_rows

    out = pl.pallas_call(
        functools.partial(_gaussian_noise_kernel, std=float(std)),
        out_shape=jax.ShapeDtypeStruct(x2.shape, x2.dtype),
        grid_spec=pltpu.PrefetchScalarGridSpec(
            num_scalar_prefetch=1,
            grid=(num_blocks,),
            in_specs=[
                pl.BlockSpec((block_rows, _LANES), lambda i, s_ref: (i, 0)),
            ],
            out_specs=pl.BlockSpec((block_rows, _LANES), lambda i, s_ref: (i, 0)),
        ),
        compiler_params=pltpu.CompilerParams(
            dimension_semantics=("parallel",),
        ),
    )(seed_arr, x2)

    return out.reshape(-1)[:total].reshape(orig_shape)


if __name__ == "__main__":
    key = jax.random.PRNGKey(0)
    B, C, H, W = 2, 4, 16, 16          # (batch_size,) + input_shape
    std = 0.05

    x = jax.random.normal(key, (B, C, H, W), dtype=jnp.float32)

    y = gaussian_noise(x, std=std, seed=1234)
    y = jax.block_until_ready(y)

    # Sanity checks: shape/dtype preserved, residual noise ~ N(0, std).
    assert y.shape == x.shape and y.dtype == x.dtype
    resid = y - x
    assert abs(float(jnp.mean(resid))) < 0.01
    assert abs(float(jnp.std(resid)) - std) < 0.02

    print("KERNEL_OK")
</pallas_src>

<mosaic_0001>
module attributes {stable_mosaic.version = 11 : i64} {
  func.func @_gaussian_noise_kernel(%arg0: i32, %arg1: memref<1xi32, #tpu.memory_space<smem>>, %arg2: memref<4x512xf32, #tpu.memory_space<vmem>>, %arg3: memref<4x512xf32, #tpu.memory_space<vmem>>) attributes {dimension_semantics = [#tpu.dimension_semantics<parallel>], iteration_bounds = array<i64: 1>, scalar_prefetch = 1 : i64, scratch_operands = 0 : i64, tpu.core_type = #tpu.core_type<tc>, window_params = [{transform_indices = @transform_0, window_bounds = array<i64: 4, 512>}, {transform_indices = @transform_1, window_bounds = array<i64: 4, 512>}]} {
    %c0 = arith.constant 0 : index
    %0 = memref.load %arg1[%c0] : memref<1xi32, #tpu.memory_space<smem>>
    %1 = tpu.iota {dimensions = array<i32: 0>} : vector<4x256xi32>
    %2 = tpu.iota {dimensions = array<i32: 1>} : vector<4x256xi32>
    %c4_i32 = arith.constant 4 : i32
    %3 = arith.muli %arg0, %c4_i32 : i32
    %4 = vector.broadcast %3 : i32 to vector<4x256xi32>
    %5 = arith.addi %4, %1 : vector<4x256xi32>
    %c512_i32 = arith.constant 512 : i32
    %6 = vector.broadcast %c512_i32 : i32 to vector<4x256xi32>
    %7 = arith.muli %5, %6 : vector<4x256xi32>
    %8 = arith.addi %7, %2 : vector<4x256xi32>
    %c256_i32 = arith.constant 256 : i32
    %9 = vector.broadcast %c256_i32 : i32 to vector<4x256xi32>
    %10 = arith.addi %8, %9 : vector<4x256xi32>
    %c-1640531527_i32 = arith.constant -1640531527 : i32
    %11 = arith.muli %0, %c-1640531527_i32 : i32
    %c-2048144789_i32 = arith.constant -2048144789 : i32
    %12 = arith.addi %11, %c-2048144789_i32 : i32
    %13 = vector.broadcast %12 : i32 to vector<4x256xi32>
    %14 = arith.xori %8, %13 : vector<4x256xi32>
    %c16_i32 = arith.constant 16 : i32
    %15 = vector.broadcast %c16_i32 : i32 to vector<4x256xi32>
    %16 = arith.shrui %14, %15 : vector<4x256xi32>
    %17 = arith.xori %14, %16 : vector<4x256xi32>
    %c2146121005_i32 = arith.constant 2146121005 : i32
    %18 = vector.broadcast %c2146121005_i32 : i32 to vector<4x256xi32>
    %19 = arith.muli %17, %18 : vector<4x256xi32>
    %c15_i32 = arith.constant 15 : i32
    %20 = vector.broadcast %c15_i32 : i32 to vector<4x256xi32>
    %21 = arith.shrui %19, %20 : vector<4x256xi32>
    %22 = arith.xori %19, %21 : vector<4x256xi32>
    %c-2073254261_i32 = arith.constant -2073254261 : i32
    %23 = vector.broadcast %c-2073254261_i32 : i32 to vector<4x256xi32>
    %24 = arith.muli %22, %23 : vector<4x256xi32>
    %c16_i32_0 = arith.constant 16 : i32
    %25 = vector.broadcast %c16_i32_0 : i32 to vector<4x256xi32>
    %26 = arith.shrui %24, %25 : vector<4x256xi32>
    %27 = arith.xori %24, %26 : vector<4x256xi32>
    %28 = vector.broadcast %12 : i32 to vector<4x256xi32>
    %29 = arith.xori %10, %28 : vector<4x256xi32>
    %c16_i32_1 = arith.constant 16 : i32
    %30 = vector.broadcast %c16_i32_1 : i32 to vector<4x256xi32>
    %31 = arith.shrui %29, %30 : vector<4x256xi32>
    %32 = arith.xori %29, %31 : vector<4x256xi32>
    %c2146121005_i32_2 = arith.constant 2146121005 : i32
    %33 = vector.broadcast %c2146121005_i32_2 : i32 to vector<4x256xi32>
    %34 = arith.muli %32, %33 : vector<4x256xi32>
    %c15_i32_3 = arith.constant 15 : i32
    %35 = vector.broadcast %c15_i32_3 : i32 to vector<4x256xi32>
    %36 = arith.shrui %34, %35 : vector<4x256xi32>
    %37 = arith.xori %34, %36 : vector<4x256xi32>
    %c-2073254261_i32_4 = arith.constant -2073254261 : i32
    %38 = vector.broadcast %c-2073254261_i32_4 : i32 to vector<4x256xi32>
    %39 = arith.muli %37, %38 : vector<4x256xi32>
    %c16_i32_5 = arith.constant 16 : i32
    %40 = vector.broadcast %c16_i32_5 : i32 to vector<4x256xi32>
    %41 = arith.shrui %39, %40 : vector<4x256xi32>
    %42 = arith.xori %39, %41 : vector<4x256xi32>
    %c8388607_i32 = arith.constant 8388607 : i32
    %43 = vector.broadcast %c8388607_i32 : i32 to vector<4x256xi32>
    %44 = arith.andi %27, %43 : vector<4x256xi32>
    %c1065353216_i32 = arith.constant 1065353216 : i32
    %45 = vector.broadcast %c1065353216_i32 : i32 to vector<4x256xi32>
    %46 = arith.ori %44, %45 : vector<4x256xi32>
    %47 = tpu.bitcast %46 : vector<4x256xi32> -> vector<4x256xf32>
    %c8388607_i32_6 = arith.constant 8388607 : i32
    %48 = vector.broadcast %c8388607_i32_6 : i32 to vector<4x256xi32>
    %49 = arith.andi %42, %48 : vector<4x256xi32>
    %c1065353216_i32_7 = arith.constant 1065353216 : i32
    %50 = vector.broadcast %c1065353216_i32_7 : i32 to vector<4x256xi32>
    %51 = arith.ori %49, %50 : vector<4x256xi32>
    %52 = tpu.bitcast %51 : vector<4x256xi32> -> vector<4x256xf32>
    %cst = arith.constant 2.000000e+00 : f32
    %53 = vector.broadcast %cst : f32 to vector<4x256xf32>
    %54 = arith.subf %53, %47 : vector<4x256xf32>
    %cst_8 = arith.constant 1.000000e+00 : f32
    %55 = vector.broadcast %cst_8 : f32 to vector<4x256xf32>
    %56 = arith.subf %52, %55 : vector<4x256xf32>
    %cst_9 = arith.constant 6.28318548 : f32
    %57 = vector.broadcast %cst_9 : f32 to vector<4x256xf32>
    %58 = arith.mulf %57, %56 : vector<4x256xf32>
    %59 = math.log %54 : vector<4x256xf32>
    %cst_10 = arith.constant -2.000000e+00 : f32
    %60 = vector.broadcast %cst_10 : f32 to vector<4x256xf32>
    %61 = arith.mulf %60, %59 : vector<4x256xf32>
    %62 = math.sqrt %61 : vector<4x256xf32>
    %cst_11 = arith.constant 5.000000e-02 : f32
    %63 = vector.broadcast %cst_11 : f32 to vector<4x256xf32>
    %64 = arith.mulf %62, %63 : vector<4x256xf32>
    %65 = math.cos %58 : vector<4x256xf32>
    %66 = arith.mulf %64, %65 : vector<4x256xf32>
    %67 = math.sin %58 : vector<4x256xf32>
    %68 = arith.mulf %64, %67 : vector<4x256xf32>
    %69 = tpu.concatenate %66, %68 in 1 : vector<4x256xf32>, vector<4x256xf32> -> vector<4x512xf32>
    %c0_12 = arith.constant 0 : index
    %c0_13 = arith.constant 0 : index
    %70 = vector.load %arg2[%c0_12, %c0_13] : memref<4x512xf32, #tpu.memory_space<vmem>>, vector<4x512xf32>
    %71 = arith.addf %70, %69 : vector<4x512xf32>
    %c0_14 = arith.constant 0 : index
    %c0_15 = arith.constant 0 : index
    %72 = vector.load %arg3[%c0_14, %c0_15] : memref<4x512xf32, #tpu.memory_space<vmem>>, vector<4x512xf32>
    tpu.vector_store %arg3[%c0_14, %c0_15], %71 {strides = array<i32>} : memref<4x512xf32, #tpu.memory_space<vmem>>, vector<4x512xf32>,
    return
  }
  func.func @transform_0(%arg0: i32, %arg1: memref<1xi32, #tpu.memory_space<smem>>) -> (i32, i32) {
    %c0_i32 = arith.constant 0 : i32
    %c0_i32_0 = arith.constant 0 : i32
    return %arg0, %c0_i32 : i32, i32
  }
  func.func @transform_1(%arg0: i32, %arg1: memref<1xi32, #tpu.memory_space<smem>>) -> (i32, i32) {
    %c0_i32 = arith.constant 0 : i32
    %c0_i32_0 = arith.constant 0 : i32
    return %arg0, %c0_i32 : i32, i32
  }
}

</mosaic_0001>

<bundles_post_ra>
// kernel: tpu_custom_call.1
= control target key start
LH: loop header
LB: loop body
LE: loop exit
PB: predicated region body
PF: predicated region fallthrough
CT: control target
= control target key end

     0   :  { %8 = vsyncpa [#allocation5], 0  ;;  %s801_s0 = inlined_call_operand.<no memory space> [shape: s32[1], index: 0, kind: input, shape index: {}]   ;;  %s802_s1 = inlined_call_operand.hbm [shape: f32[4,512], index: 1, kind: input, shape index: {}]   ;;  %s803_s2 = inlined_call_operand.hbm [shape: f32[4,512], index: 2, kind: output, shape index: {}]  }
   0x1   :  { %9 = vsyncpa [#allocation6], 0  ;;  %s661_s9 = smov [#allocation4]   ;;  %s613_s13 = scalar_lea.hbm %s802_s1, 256 }
   0x2   :  { %s16_s10 = sshll.u32 %s661_s9, 4  ;;  %p614_p0 = scmp.ne.s32.totalorder %s802_s1, %s613_s13  ;;  %s17_s10 = int_to_ptr.vmem [resolvable:$true] %s16_s10 }
   0x3   :  { %p617_p1 = scmp.lt.u32.totalorder %s613_s13, %s802_s1 }
   0x5   :  { %p619_p2 = pnand %p617_p1, %p614_p0 }
   0x7   :  { %622 = shalt.err (!%p619_p2)
}
   0x8   :  { %s623_s18 = scalar_lea.vmem %s17_s10, 256  ;;  %p628_p4 = scmp.lt.s32.totalorder %s17_s10, %s17_s10 }
   0x9   :  { %p624_p3 = scmp.ne.s32.totalorder %s17_s10, %s623_s18  ;;  %p629_p5 = scmp.lt.s32.totalorder %s623_s18, %s623_s18 }
   0xb   :  { %p630_p6 = por %p629_p5, %p628_p4 }
   0xd   :  { %p631_p7 = pnand %p630_p6, %p624_p3 }
   0xf   :  { %634 = shalt.err (!%p631_p7)
}
  0x10   :  { %19 = dma.hbm_to_vmem [thread:$0]  %s802_s1, 256, %s17_s10, [#allocation5]  }
  0x11   :  { %657 = dma.done.wait [#allocation5], 256  }
  0x12   :  { %658 = vsyncadd [#allocation5], 4294967040  ;;  %v24_v0 = vlaneseq  ;;  %s37_s23 = smul.u32 2654435769, %s801_s0  ;;  %s668_s0 = smov [#allocation7]  }
  0x13   :  { %s554_s1 = sshll.u32 %s668_s0, 4  ;;  %s555_s1 = int_to_ptr.vmem [resolvable:$true] %s554_s1 }
  0x14   :  { %v25_v1 = vshrl.u32 %v24_v0, 7  ;;  %v27_v2 = vand.u32 127, %v24_v0  ;;  %s38_s24 = sadd.s32 2246822507, %s37_s23  ;;  %s635_s25 = scalar_lea.vmem %s555_s1, 256 }
  0x15   :  { %v39_v7 = vstv %s38_s24  ;;  %p636_p8 = scmp.ne.s32.totalorder %s555_s1, %s635_s25  ;;  %p640_p9 = scmp.lt.s32.totalorder %s555_s1, %s555_s1 }
  0x16   :  { %v28_v3 = vadd.s32 128, %v27_v2  ;;  %v32_v4 = vmul.u32 512, %v25_v1  ;;  %p641_p10 = scmp.lt.s32.totalorder %s635_s25, %s635_s25 }
  0x18   :  { %v33_v5 = vadd.s32 %v32_v4, %v27_v2  ;;  %v34_v6 = vadd.s32 %v32_v4, %v28_v3  ;;  %p642_p11 = por %p641_p10, %p640_p9 }
  0x1a   :  { %v35_v8 = vadd.s32 256, %v33_v5  ;;  %v36_v9 = vadd.s32 256, %v34_v6  ;;  %v40_v20 = vxor.u32 %v39_v7, %v33_v5  ;;  %v41_v21 = vxor.u32 %v39_v7, %v34_v6  ;;  %p643_p12 = pnand %p642_p11, %p636_p8 }
  0x1b   :  { %v662_v5 = vmov 683565275  }
  0x1c   :  { %v58_v10 = vxor.u32 %v39_v7, %v35_v8  ;;  %v59_v11 = vxor.u32 %v39_v7, %v36_v9  ;;  %v42_v26 = vshrl.u32 %v40_v20, 16  ;;  %v43_v27 = vshrl.u32 %v41_v21, 16 }
  0x1d   :  { %v663_v7 = vmov 2475754826   ;;  %v664_v9 = vmov 2131351028  }
  0x1e   :  { %v60_v12 = vshrl.u32 %v58_v10, 16  ;;  %v61_v13 = vshrl.u32 %v59_v11, 16  ;;  %v44_v32 = vxor.u32 %v42_v26, %v40_v20  ;;  %v45_v33 = vxor.u32 %v43_v27, %v41_v21 }
  0x20   :  { %v62_v14 = vxor.u32 %v60_v12, %v58_v10  ;;  %v63_v15 = vxor.u32 %v61_v13, %v59_v11  ;;  %v46_v38 = vmul.u32 2146121005, %v44_v32  ;;  %v47_v39 = vmul.u32 2146121005, %v45_v33 }
  0x21   :  { %v665_v11 = vmov 2102212464   ;;  %v666_v13 = vmov 920167782  }
  0x22   :  { %v64_v16 = vmul.u32 2146121005, %v62_v14  ;;  %v65_v17 = vmul.u32 2146121005, %v63_v15  ;;  %v48_v44 = vshrl.u32 %v46_v38, 15  ;;  %v49_v45 = vshrl.u32 %v47_v39, 15 }
  0x24   :  { %v66_v18 = vshrl.u32 %v64_v16, 15  ;;  %v67_v19 = vshrl.u32 %v65_v17, 15  ;;  %v50_v50 = vxor.u32 %v48_v44, %v46_v38  ;;  %v51_v52 = vxor.u32 %v49_v45, %v47_v39 }
  0x26   :  { %v68_v22 = vxor.u32 %v66_v18, %v64_v16  ;;  %v69_v23 = vxor.u32 %v67_v19, %v65_v17  ;;  %v52_v57 = vmul.u32 2221713035, %v50_v50  ;;  %v53_v59 = vmul.u32 2221713035, %v51_v52 }
  0x28   :  { %v70_v24 = vmul.u32 2221713035, %v68_v22  ;;  %v71_v25 = vmul.u32 2221713035, %v69_v23  ;;  %v54_v0 = vshrl.u32 %v52_v57, 16  ;;  %v55_v1 = vshrl.u32 %v53_v59, 16 }
  0x29   :  { %v667_v22 = vmov 1326507024  }
  0x2a   :  { %v72_v28 = vshrl.u32 %v70_v24, 16  ;;  %v73_v29 = vshrl.u32 %v71_v25, 16  ;;  %v56_v38 = vxor.u32 %v54_v0, %v52_v57 }
  0x2c   :  { %v74_v30 = vxor.u32 %v72_v28, %v70_v24  ;;  %v75_v31 = vxor.u32 %v73_v29, %v71_v25 }
  0x2e   :  { %v82_v34 = vand.u32 8388607, %v74_v30  ;;  %v83_v35 = vand.u32 8388607, %v75_v31 }
  0x30   :  { %v84_v36 = vor.u32 1065353216, %v82_v34  ;;  %v85_v37 = vor.u32 1065353216, %v83_v35 }
  0x32   :  { %v563_v40 = vadd.f32 -1.0, %v84_v36  ;;  %v564_v41 = vadd.f32 -1.0, %v85_v37 }
  0x34   :  { %v699_v42 = vmul.f32 6.2831855, %v563_v40  ;;  %v701_v43 = vmul.f32 6.2831855, %v564_v41  ;;  %v57_v41 = vxor.u32 %v55_v1, %v53_v59 }
  0x36   :  { %v119_v46 = vand.u32 2139095040, %v699_v42  ;;  %v222_v47 = vand.u32 2139095040, %v701_v43  ;;  %v116_v48 = vand.u32 2147483647, %v699_v42  ;;  %v219_v60 = vand.u32 2147483647, %v701_v43 }
  0x37   :  { %v77_v59 = vand.u32 8388607, %v57_v41  ;;  %vm118_vm14 = vcmp.lt.s32.totalorder %v699_v42, 0 }
  0x38   :  { %v120_v49 = vshrl.u32 %v119_v46, 23  ;;  %v223_v51 = vshrl.u32 %v222_v47, 23  ;;  %v123_v55 = vand.u32 8388607, %v116_v48  ;;  %v226_v3 = vand.u32 8388607, %v219_v60 }
  0x39   :  { %vm756_vm15 = vcmp.le.f32.partialorder %v116_v48, 0.7853982 }
  0x3a   :  { %v565_v53 = vadd.s32 4294967169, %v120_v49  ;;  %v569_v54 = vadd.s32 4294967169, %v223_v51  ;;  %v124_v62 = vor.u32 8388608, %v123_v55  ;;  %v227_v46 = vor.u32 8388608, %v226_v3 }
  0x3b   :  { %v76_v55 = vand.u32 8388607, %v56_v38 }
  0x3c   :  { %v126_v56 = vadd.s32 1, %v565_v53  ;;  %v229_v58 = vadd.s32 1, %v569_v54  ;;  %v711_v15 = vshll.u32 %v124_v62, 8 }
  0x3e   :  { %vm127_vm0 = vcmp.gt.s32.totalorder %v126_v56, 0  ;;  %vm230_vm1 = vcmp.gt.s32.totalorder %v229_v58, 0 }
  0x3f   :  { %v128_v61 = vsel %vm127_vm0, %v126_v56, 0  ;;  %v231_v16 = vsel %vm230_vm1, %v229_v58, 0  ;;  %vm221_vm0 = vcmp.lt.s32.totalorder %v701_v43, 0  ;;  %vm220_vm1 = vcmp.le.f32.partialorder %v219_v60, 0.7853982 }
  0x40   :  { %v130_v63 = vand.u32 31, %v128_v61  ;;  %v129_v2 = vshrl.u32 %v128_v61, 5  ;;  %v233_v29 = vand.u32 31, %v231_v16  ;;  %v232_v56 = vshrl.u32 %v231_v16, 5 }
  0x42   :  { %v131_v4 = vsub.s32 32, %v130_v63  ;;  %v133_v6 = vshll.u32 %v662_v5, %v130_v63  ;;  %v136_v8 = vshll.u32 %v663_v7, %v130_v63  ;;  %v139_v10 = vshll.u32 %v664_v9, %v130_v63 }
  0x43   :  { %v142_v12 = vshll.u32 %v665_v11, %v130_v63  ;;  %v145_v14 = vshll.u32 %v666_v13, %v130_v63  ;;  %vm148_vm2 = vcmp.lt.s32.totalorder %v129_v2, 1  ;;  %vm149_vm3 = vcmp.lt.s32.totalorder %v129_v2, 2 }
  0x44   :  { %v132_v17 = vshrl.u32 %v662_v5, %v131_v4  ;;  %v134_v18 = vshrl.u32 %v663_v7, %v131_v4  ;;  %v137_v19 = vshrl.u32 %v664_v9, %v131_v4  ;;  %v140_v20 = vshrl.u32 %v665_v11, %v131_v4 }
  0x45   :  { %v143_v21 = vshrl.u32 %v666_v13, %v131_v4  ;;  %v146_v23 = vshrl.u32 %v667_v22, %v131_v4  ;;  %vm151_vm4 = vcmp.lt.s32.totalorder %v129_v2, 4  ;;  %vm150_vm5 = vcmp.lt.s32.totalorder %v129_v2, 3 }
  0x46   :  { %v135_v24 = vor.u32 %v134_v18, %v133_v6  ;;  %v138_v25 = vor.u32 %v137_v19, %v136_v8  ;;  %v141_v26 = vor.u32 %v140_v20, %v139_v10  ;;  %v234_v37 = vsub.s32 32, %v233_v29 }
  0x47   :  { %v144_v27 = vor.u32 %v143_v21, %v142_v12  ;;  %v147_v28 = vor.u32 %v146_v23, %v145_v14  ;;  %v236_v51 = vshll.u32 %v662_v5, %v233_v29  ;;  %v239_v57 = vshll.u32 %v663_v7, %v233_v29 }
  0x48   :  { %v152_v30 = vsel %vm148_vm2, %v132_v17, %v135_v24  ;;  %v153_v31 = vsel %vm151_vm4, %v141_v26, 2102212464  ;;  %v156_v32 = vsel %vm148_vm2, %v135_v24, %v138_v25  ;;  %v160_v33 = vsel %vm148_vm2, %v138_v25, %v141_v26 }
  0x49   :  { %v154_v34 = vsel %vm150_vm5, %v138_v25, %v153_v31  ;;  %v157_v35 = vsel %vm151_vm4, %v144_v27, 920167782  ;;  %v161_v36 = vsel %vm151_vm4, %v147_v28, 1326507024  ;;  %v237_v54 = vshrl.u32 %v663_v7, %v234_v37 }
  0x4a   :  { %v158_v39 = vsel %vm150_vm5, %v141_v26, %v157_v35  ;;  %v162_v40 = vsel %vm150_vm5, %v144_v27, %v161_v36  ;;  %v155_v47 = vsel %vm149_vm3, %v152_v30, %v154_v34  ;;  %v240_v58 = vshrl.u32 %v664_v9, %v234_v37 }
  0x4b   :  { %v159_v44 = vsel %vm149_vm3, %v156_v32, %v158_v39  ;;  %v163_v45 = vsel %vm149_vm3, %v160_v33, %v162_v40  ;;  %v171_v61 = vmul.u32 %v711_v15, %v155_v47  ;;  %v242_v62 = vshll.u32 %v664_v9, %v233_v29 }
  0x4c   :  { %v718_v49 = vmul.u32.u64.low %v711_v15, %v163_v45  ;;  %v719_v50 = vmul.u32.u64.high %v711_v15, %v163_v45, %v718_v49  ;;  %v722_v52 = vmul.u32.u64.low %v711_v15, %v159_v44  ;;  %v723_v53 = vmul.u32.u64.high %v711_v15, %v159_v44, %v722_v52 }
  0x4d   :  { %v267_v63 = vshll.u32 %v227_v46, 8  ;;  %v235_v0 = vshrl.u32 %v662_v5, %v234_v37  ;;  %v238_v1 = vor.u32 %v237_v54, %v236_v51  ;;  %v241_v2 = vor.u32 %v240_v58, %v239_v57 }
  0x4e   :  { %vm173_vm6 = vc.u32 %v719_v50, %v722_v52  ;;  %v174_v3 = vadd.s32 1, %v723_v53  ;;  %v243_v4 = vshrl.u32 %v665_v11, %v234_v37  ;;  %v245_v6 = vshll.u32 %v665_v11, %v233_v29 }
  0x4f   :  { %v246_v8 = vshrl.u32 %v666_v13, %v234_v37  ;;  %v248_v10 = vshll.u32 %v666_v13, %v233_v29  ;;  %v249_v12 = vshrl.u32 %v667_v22, %v234_v37  ;;  %vm251_vm7 = vcmp.lt.s32.totalorder %v232_v56, 1 }
  0x50   :  { %vm252_vm8 = vcmp.lt.s32.totalorder %v232_v56, 2  ;;  %v175_v7 = vsel %vm173_vm6, %v174_v3, %v723_v53  ;;  %v244_v14 = vor.u32 %v243_v4, %v242_v62  ;;  %vm253_vm9 = vcmp.lt.s32.totalorder %v232_v56, 3 }
  0x51   :  { %v247_v9 = vor.u32 %v246_v8, %v245_v6  ;;  %v176_v15 = vadd.s32 %v175_v7, %v171_v61  ;;  %v250_v16 = vor.u32 %v249_v12, %v248_v10  ;;  %vm254_vm10 = vcmp.lt.s32.totalorder %v232_v56, 4 }
  0x52   :  { %v255_v5 = vsel %vm251_vm7, %v235_v0, %v238_v1  ;;  %v256_v17 = vsel %vm254_vm10, %v244_v14, 2102212464  ;;  %v259_v18 = vsel %vm251_vm7, %v238_v1, %v241_v2  ;;  %v263_v20 = vsel %vm251_vm7, %v241_v2, %v244_v14 }
  0x53   :  { %v260_v19 = vsel %vm254_vm10, %v247_v9, 920167782  ;;  %v177_v21 = vadd.s32 536870912, %v176_v15  ;;  %v257_v11 = vsel %vm253_vm9, %v241_v2, %v256_v17  ;;  %v264_v13 = vsel %vm254_vm10, %v250_v16, 1326507024 }
  0x54   :  { %v261_v23 = vsel %vm253_vm9, %v244_v14, %v260_v19  ;;  %v258_v22 = vsel %vm252_vm8, %v255_v5, %v257_v11  ;;  %v265_v25 = vsel %vm253_vm9, %v247_v9, %v264_v13  ;;  %v78_v30 = vor.u32 1065353216, %v76_v55 }
  0x55   :  { %v262_v24 = vsel %vm252_vm8, %v259_v18, %v261_v23  ;;  %v733_v26 = vshrl.u32 %v177_v21, 30  ;;  %v266_v27 = vsel %vm252_vm8, %v263_v20, %v265_v25  ;;  %v79_v33 = vor.u32 1065353216, %v77_v59 }
  0x56   :  { %v736_v28 = vmul.u32.u64.low %v267_v63, %v262_v24  ;;  %v737_v29 = vmul.u32.u64.high %v267_v63, %v262_v24, %v736_v28  ;;  %v739_v31 = vmul.u32.u64.low %v267_v63, %v266_v27  ;;  %v740_v32 = vmul.u32.u64.high %v267_v63, %v266_v27, %v739_v31 }
  0x57   :  { %v179_v34 = vshll.u32 %v733_v26, 30  ;;  %v274_v35 = vmul.u32 %v267_v63, %v258_v22  ;;  %v88_v38 = vsub.f32 2.0, %v78_v30  ;;  %v89_v39 = vsub.f32 2.0, %v79_v33 }
  0x58   :  { %v277_v37 = vadd.s32 1, %v737_v29  ;;  %vm276_vm11 = vc.u32 %v740_v32, %v736_v28  ;;  %v172_v54 = vadd.s32 %v722_v52, %v719_v50  ;;  %v275_v14 = vadd.s32 %v736_v28, %v740_v32 }
  0x59   :  { %v180_v36 = vsub.s32 %v176_v15, %v179_v34  ;;  %597 = vlog2.f32 %v88_v38  ;;  %v202_v11 = vsub.s32 4, %v733_v26 }
  0x5a   :  { %v278_v41 = vsel %vm276_vm11, %v277_v37, %v737_v29  ;;  %599 = vlog2.f32 %v89_v39 }
  0x5b   :  { %v182_v40 = vsub.s32 0, %v180_v36  ;;  %v279_v44 = vadd.s32 %v278_v41, %v274_v35  ;;  %v203_v27 = vsel %vm118_vm14, %v202_v11, %v733_v26 }
  0x5c   :  { %v205_v31 = vsel %vm756_vm15, 0, %v203_v27 }
  0x5d   :  { %v566_v45 = vmin.u32 %v182_v40, %v180_v36  ;;  %v280_v46 = vadd.s32 536870912, %v279_v44  ;;  %v417_v35 = vadd.s32 3, %v205_v31  ;;  %v209_v41 = vand.u32 3, %v205_v31 }
  0x5f   :  { %v184_v47 = vclz %v566_v45  ;;  %v281_v49 = vshrl.u32 %v280_v46, 30  ;;  %v418_v45 = vand.u32 3, %v417_v35  ;;  %vm211_vm3 = vcmp.eq.s32.totalorder %v209_v41, 0 }
  0x60   :  { %vm214_vm4 = vcmp.eq.s32.totalorder %v209_v41, 2  ;;  %vm210_vm9 = vcmp.lt.s32.totalorder %v209_v41, 2 }
  0x61   :  { %v567_v51 = vadd.s32 4294967294, %v184_v47  ;;  %v282_v53 = vshll.u32 %v281_v49, 30  ;;  %v305_v30 = vsub.s32 4, %v281_v49  ;;  %vm420_vm5 = vcmp.eq.s32.totalorder %v418_v45, 0 }
  0x62   :  { %vm423_vm6 = vcmp.eq.s32.totalorder %v418_v45, 2  ;;  %vm419_vm10 = vcmp.lt.s32.totalorder %v418_v45, 2 }
  0x63   :  { %vm568_vm12 = vcmp.lt.s32.totalorder %v567_v51, 0  ;;  %v283_v56 = vsub.s32 %v279_v44, %v282_v53  ;;  %v598_v0 = vpop.eup %597  ;;  %v306_v34 = vsel %vm221_vm0, %v305_v30, %v281_v49 }
  0x64   :  { %v187_v55 = vsel %vm568_vm12, 0, %v567_v51  ;;  %v600_v2 = vpop.eup %599  ;;  %v95_v8 = vmul.f32 0.6931472, %v598_v0  ;;  %v308_v39 = vsel %vm220_vm1, 0, %v306_v34  ;;  %vm208_vm12 = vweird.f32 %v699_v42 }
  0x65   :  { %v188_v57 = vsub.s32 32, %v187_v55  ;;  %v189_v58 = vshll.u32 %v180_v36, %v187_v55  ;;  %v192_v59 = vsub.s32 4294967266, %v187_v55  ;;  %v285_v61 = vsub.s32 0, %v283_v56 }
  0x66   :  { %v97_v7 = vmul.f32 0.6931472, %v600_v2  ;;  %v749_v9 = vmul.f32 -2.0, %v95_v8  ;;  %v521_v49 = vadd.s32 3, %v308_v39 }
  0x67   :  { %v190_v62 = vshrl.u32 %v172_v54, %v188_v57  ;;  %v193_v63 = vadd.s32 127, %v192_v59  ;;  %v570_v1 = vmin.u32 %v285_v61, %v283_v56  ;;  %v312_v57 = vand.u32 3, %v308_v39 }
  0x68   :  { %v752_v5 = vmul.f32 -2.0, %v97_v7  ;;  %601 = vrsqrt.f32 %v749_v9  ;;  %vm102_vm2 = vcmp.eq.f32.partialorder %v749_v9, inf  ;;  %v105_v60 = vand.u32 2147483648, %v749_v9 }
  0x69   :  { %v191_v3 = vor.u32 %v190_v62, %v189_v58  ;;  %v194_v4 = vshll.u32 %v193_v63, 23  ;;  %v287_v6 = vclz %v570_v1  ;;  %vm104_vm7 = vcmp.eq.f32.partialorder %v749_v9, 0.0 }
  0x6a   :  { %603 = vrsqrt.f32 %v752_v5  ;;  %vm109_vm8 = vcmp.eq.f32.partialorder %v752_v5, inf  ;;  %v522_v58 = vand.u32 3, %v521_v49  ;;  %vm111_vm11 = vcmp.eq.f32.partialorder %v752_v5, 0.0 }
  0x6b   :  { %v195_v10 = vor.u32 4788187, %v194_v4  ;;  %v198_v12 = vcvt.s32.f32 %v191_v3  ;;  %v571_v50 = vadd.s32 4294967294, %v287_v6 }
  0x6d   :  { %v196_v52 = vand.u32 2147483647, %v195_v10  ;;  %vm572_vm13 = vcmp.lt.s32.totalorder %v571_v50, 0 }
  0x6e   :  { %v290_v16 = vsel %vm572_vm13, 0, %v571_v50  ;;  %vm317_vm13 = vcmp.eq.s32.totalorder %v312_v57, 2 }
  0x6f   :  { %v199_v15 = vmul.f32 %v198_v12, %v196_v52  ;;  %v291_v17 = vsub.s32 32, %v290_v16  ;;  %v292_v18 = vshll.u32 %v283_v56, %v290_v16  ;;  %v295_v19 = vsub.s32 4294967266, %v290_v16 }
  0x70   :  { %v112_v56 = vand.u32 2147483648, %v752_v5 }
  0x71   :  { %v200_v21 = vxor.u32 2147483648, %v199_v15  ;;  %v293_v23 = vshrl.u32 %v275_v14, %v291_v17  ;;  %v296_v13 = vadd.s32 127, %v295_v19 }
  0x72   :  { %v602_v37 = vpop.eup %601 }
  0x73   :  { %v201_v22 = vsel %vm118_vm14, %v200_v21, %v199_v15  ;;  %v294_v48 = vor.u32 %v293_v23, %v292_v18  ;;  %v297_v25 = vshll.u32 %v296_v13, 23  ;;  %v101_v47 = vmul.f32 %v602_v37, %v749_v9  ;;  %v534_v13 = vld [vmem:[#allocation4] sm:$0xff] }
  0x74   :  { %v204_v24 = vsel %vm756_vm15, %v699_v42, %v201_v22  ;;  %v604_v26 = vpop.eup %603  ;;  %vm527_vm14 = vcmp.eq.s32.totalorder %v522_v58, 2  ;;  %vm313_vm15 = vcmp.lt.s32.totalorder %v312_v57, 2  ;;  %v535_v22 = vld [vmem:[#allocation4 + $0x8] sm:$0xff] }
  0x75   :  { %605 = vcosq.f32 %v204_v24  ;;  %v298_v28 = vor.u32 4788187, %v297_v25  ;;  %v301_v29 = vcvt.s32.f32 %v294_v48  ;;  %v108_v51 = vmul.f32 %v604_v26, %v752_v5 }
  0x76   :  { %607 = vsinq.f32 %v204_v24  ;;  %v103_v55 = vsel %vm102_vm2, %v749_v9, %v101_v47  ;;  %vm523_vm2 = vcmp.lt.s32.totalorder %v522_v58, 2 }
  0x77   :  { %v299_v32 = vand.u32 2147483647, %v298_v28  ;;  %v106_v0 = vsel %vm104_vm7, %v105_v60, %v103_v55  ;;  %v110_v1 = vsel %vm109_vm8, %v752_v5, %v108_v51 }
  0x78   :  { %v113_v6 = vsel %vm111_vm11, %v112_v56, %v110_v1  ;;  %v114_v8 = vmul.f32 0.05, %v106_v0 }
  0x79   :  { %v302_v33 = vmul.f32 %v301_v29, %v299_v32  ;;  %v115_v14 = vmul.f32 0.05, %v113_v6 }
  0x7b   :  { %v303_v36 = vxor.u32 2147483648, %v302_v33 }
  0x7d   :  { %v304_v38 = vsel %vm221_vm0, %v303_v36, %v302_v33  ;;  %vm314_vm0 = vcmp.eq.s32.totalorder %v312_v57, 0 }
  0x7e   :  { %v307_v44 = vsel %vm220_vm1, %v701_v43, %v304_v38  ;;  %vm524_vm1 = vcmp.eq.s32.totalorder %v522_v58, 0 }
  0x7f   :  { %v606_v40 = vpop.eup %605  ;;  %609 = vcosq.f32 %v307_v44 }
  0x80   :  { %v608_v46 = vpop.eup %607  ;;  %611 = vsinq.f32 %v307_v44  ;;  %v215_v54 = vxor.u32 2147483648, %v606_v40 }
  0x81   :  { %v212_v53 = vxor.u32 2147483648, %v608_v46 }
  0x82   :  { %v216_v61 = vsel %vm214_vm4, %v215_v54, %v608_v46  ;;  %v425_v63 = vsel %vm423_vm6, %v215_v54, %v608_v46 }
  0x83   :  { %v213_v59 = vsel %vm211_vm3, %v606_v40, %v212_v53  ;;  %v422_v62 = vsel %vm420_vm5, %v606_v40, %v212_v53  ;;  %vm311_vm3 = vweird.f32 %v701_v43 }
  0x84   :  { %v217_v2 = vsel %vm210_vm9, %v213_v59, %v216_v61  ;;  %v426_v3 = vsel %vm419_vm10, %v422_v62, %v425_v63 }
  0x85   :  { %v218_v7 = vsel %vm208_vm12, nan, %v217_v2  ;;  %v427_v52 = vsel %vm208_vm12, nan, %v426_v3 }
  0x86   :  { %v322_v17 = vmul.f32 %v218_v7, %v114_v8  ;;  %v532_v19 = vmul.f32 %v427_v52, %v114_v8 }
  0x89   :  { %v610_v4 = vpop.eup %609 }
  0x8a   :  { %v612_v10 = vpop.eup %611  ;;  %v318_v12 = vxor.u32 2147483648, %v610_v4 }
  0x8b   :  { %v315_v50 = vxor.u32 2147483648, %v612_v10 }
  0x8c   :  { %v319_v42 = vsel %vm317_vm13, %v318_v12, %v612_v10  ;;  %v529_v9 = vsel %vm527_vm14, %v318_v12, %v612_v10 }
  0x8d   :  { %v316_v15 = vsel %vm314_vm0, %v610_v4, %v315_v50  ;;  %v526_v16 = vsel %vm524_vm1, %v610_v4, %v315_v50 }
  0x8e   :  { %v320_v5 = vsel %vm313_vm15, %v316_v15, %v319_v42  ;;  %v530_v18 = vsel %vm523_vm2, %v526_v16, %v529_v9 }
  0x8f   :  { %v321_v20 = vsel %vm311_vm3, nan, %v320_v5  ;;  %v531_v21 = vsel %vm311_vm3, nan, %v530_v18 }
  0x90   :  { %v323_v11 = vmul.f32 %v321_v20, %v115_v14  ;;  %v533_v23 = vmul.f32 %v531_v21, %v115_v14 }
  0x92   :  { %v540_v24 = vcombine.low %v322_v17, %v323_v11  ;;  %v541_v48 = vcombine.low %v532_v19, %v533_v23 }
  0x94   :  { %v544_v25 = vadd.f32 %v540_v24, %v534_v13  ;;  %v545_v43 = vadd.f32 %v541_v48, %v535_v22 }
  0x96   :  { %546 = vst [vmem:[#allocation7] sm:$0xff] %v544_v25  ;;  %547 = vst [vmem:[#allocation7 + $0x8] sm:$0xff] %v545_v43 }
  0x97   :  { %646 = shalt.err (!%p643_p12)
}
  0x98   :  { %s647_s28 = scalar_lea.hbm %s803_s2, 256 }
  0x99   :  { %p648_p13 = scmp.ne.s32.totalorder %s803_s2, %s647_s28  ;;  %p651_p0 = scmp.lt.u32.totalorder %s647_s28, %s803_s2 }
  0x9b   :  { %p653_p1 = pnand %p651_p0, %p648_p13 }
  0x9d   :  { %656 = shalt.err (!%p653_p1)
}
  0x9e   :  { %557 = dma.vmem_to_hbm [thread:$0]  %s555_s1, 256, %s803_s2, [#allocation6]  }
  0x9f   :  { %659 = dma.done.wait [#allocation6], 256  }
  0xa0   :  { %660 = vsyncadd [#allocation6], 4294967040 }
  0xa1   :  { %561 = vsyncpa [#allocation5], 1 }
  0xa2   :  { %562 = vsyncpa [#allocation6], 1 }

</bundles_post_ra>
